<compile_context>
chip_gen: v5e
topology: v5e:2x2
jax: 0.10.0
libtpu: 0.0.40
codegen_flags: <defaults>
</compile_context>

<pallas_src>
import jax
import jax.numpy as jnp
from jax.experimental import pallas as pl
from jax.experimental.pallas import tpu as pltpu

# Deterministic parameter from the module's __init__: 1-D Gaussian taps.
GAUSS_K = (0.05, 0.25, 0.4, 0.25, 0.05)  # 2D kernel = outer(GAUSS_K, GAUSS_K)


# ------------------------- constant-matrix construction (wrapper side) -------------------------
def _blur_band(n):
    """(n, n) band matrix M such that M @ v == replicate-padded 5-tap blur of v along axis 0."""
    idx = jnp.arange(n)
    m = jnp.zeros((n, n), jnp.float32)
    for a, kv in enumerate(GAUSS_K):
        src = jnp.clip(idx + (a - 2), 0, n - 1)   # replicate padding == index clamping
        m = m.at[idx, src].add(jnp.float32(kv))   # duplicate clamps accumulate (edge taps)
    return m


def _collapsed_mats(h, w):
    """Constant (H,H)/(W,W) matrices with laplacian(d) = d - Ch @ d @ Cw."""
    bh = _blur_band(h)            # row blur:  blur_h(img) = bh @ img
    bw = _blur_band(w).T          # col blur:  blur_w(img) = img @ bw
    mh = 2.0 * (jnp.arange(h) % 2 == 0).astype(jnp.float32)
    mw = 2.0 * (jnp.arange(w) % 2 == 0).astype(jnp.float32)
    hi = jax.lax.Precision.HIGHEST
    ch = jnp.matmul(bh, mh[:, None] * bh, precision=hi)   # Bh @ diag(2*mh) @ Bh
    cw = jnp.matmul(bw, mw[:, None] * bw, precision=hi)   # Bw @ diag(2*mw) @ Bw
    return ch, cw


# ------------------------- Pallas kernel -------------------------
def edge_loss_kernel(ch_ref, cw_ref, x_ref, y_ref, out_ref):
    # x_ref / y_ref: (B, H, W) blocks of channel images in their native dtype.
    d = x_ref[...].astype(jnp.float32) - y_ref[...].astype(jnp.float32)
    bsz, h, w = d.shape
    ch = jnp.broadcast_to(ch_ref[...], (bsz, h, h))
    cw = jnp.broadcast_to(cw_ref[...], (bsz, w, w))
    # laplacian(d) = d - Ch @ d @ Cw   (two batched MXU matmuls)
    t = jnp.einsum('bhk,bkw->bhw', ch, d, preferred_element_type=jnp.float32)
    f2 = jnp.einsum('bhw,bwv->bhv', t, cw, preferred_element_type=jnp.float32)
    # One partial sum per grid block (no shared accumulator -> grid can be "parallel").
    out_ref[0, 0] = jnp.sum(jnp.abs(d - f2))


def edge_loss(x, y, loss_weight=1.0, block_channels=8):
    """EdgeLoss.forward(x, y): x, y are NCHW arrays. Returns a scalar (reduction='mean')."""
    n, c, h, w = x.shape
    nc = n * c
    xr = x.reshape(nc, h, w)        # keep native dtype; cast happens inside the kernel
    yr = y.reshape(nc, h, w)

    bsz = max(1, min(block_channels, nc))
    g = pl.cdiv(nc, bsz)
    nc_pad = g * bsz
    if nc_pad != nc:
        # Zero padding is exact: laplacian(0) == 0, so padded images add 0 to the sum.
        pad = ((0, nc_pad - nc), (0, 0), (0, 0))
        xr = jnp.pad(xr, pad)
        yr = jnp.pad(yr, pad)

    ch, cw = _collapsed_mats(h, w)

    # TODO(synk): for large H*W, row-strip the H axis (4-row halo per blur stage) so that
    # 2 inputs x 2 pipeline buffers fit the per-generation scoped-VMEM budget
    # (v5e 16 MiB / v7x 32 MiB defaults); full-image blocks here are sized for small images.
    partial = pl.pallas_call(
        edge_loss_kernel,
        out_shape=jax.ShapeDtypeStruct((g, 1), jnp.float32),
        grid=(g,),
        in_specs=[
            pl.BlockSpec((h, h), lambda i: (0, 0)),          # Ch: resident constant
            pl.BlockSpec((w, w), lambda i: (0, 0)),          # Cw: resident constant
            pl.BlockSpec((bsz, h, w), lambda i: (i, 0, 0)),  # x block of B channel images
            pl.BlockSpec((bsz, h, w), lambda i: (i, 0, 0)),  # y block
        ],
        out_specs=pl.BlockSpec((1, 1), lambda i: (i, 0), memory_space=pltpu.SMEM),
        compiler_params=pltpu.CompilerParams(
            dimension_semantics=("parallel",)),              # per-block partials -> megacore safe
    )(ch, cw, xr, yr)

    total = jnp.sum(partial)                                  # tiny final reduction in wrapper
    return total / jnp.float32(nc * h * w) * jnp.float32(loss_weight)


# ------------------------- pure-JAX reference (independent of the algebraic collapse) -------------------------
def _ref_conv_gauss(img3):  # (NC, H, W), direct (non-separable) 5x5 conv with replicate pad
    _, h, w = img3.shape
    p = jnp.pad(img3, ((0, 0), (2, 2), (2, 2)), mode="edge")
    out = jnp.zeros_like(img3)
    for a in range(5):
        for b in range(5):
            out = out + GAUSS_K[a] * GAUSS_K[b] * p[:, a:a + h, b:b + w]
    return out


def _ref_edge_loss(x, y, loss_weight=1.0):
    n, c, h, w = x.shape
    xr = x.reshape(n * c, h, w).astype(jnp.float32)
    yr = y.reshape(n * c, h, w).astype(jnp.float32)
    ri = jnp.arange(h)[:, None]
    ci = jnp.arange(w)[None, :]
    mask = (((ri % 2) == 0) & ((ci % 2) == 0)).astype(jnp.float32)[None]

    def lap(a):
        f1 = _ref_conv_gauss(a)
        f2 = _ref_conv_gauss(f1 * 4.0 * mask)
        return a - f2

    return jnp.mean(jnp.abs(lap(xr) - lap(yr))) * loss_weight


if __name__ == "__main__":
    key = jax.random.PRNGKey(0)
    kx, ky = jax.random.split(key)
    # EdgeLoss hard-codes a 3-channel depthwise kernel -> C must be 3.
    x = jax.random.uniform(kx, (2, 3, 16, 16), dtype=jnp.float32)
    y = jax.random.uniform(ky, (2, 3, 16, 16), dtype=jnp.float32)

    loss = jax.block_until_ready(edge_loss(x, y, loss_weight=1.0))
    ref = jax.block_until_ready(_ref_edge_loss(x, y, loss_weight=1.0))
    assert abs(float(loss) - float(ref)) <= 1e-4 * (1.0 + abs(float(ref))), (float(loss), float(ref))
    print("KERNEL_OK")
</pallas_src>

<mosaic_0001>
module attributes {stable_mosaic.version = 11 : i64} {
  func.func @edge_loss_kernel(%arg0: i32, %arg1: memref<16x16xf32, #tpu.memory_space<vmem>>, %arg2: memref<16x16xf32, #tpu.memory_space<vmem>>, %arg3: memref<6x16x16xf32, #tpu.memory_space<vmem>>, %arg4: memref<6x16x16xf32, #tpu.memory_space<vmem>>, %arg5: memref<1x1xf32, #tpu.memory_space<smem>>) attributes {dimension_semantics = [#tpu.dimension_semantics<parallel>], iteration_bounds = array<i64: 1>, scalar_prefetch = 0 : i64, scratch_operands = 0 : i64, tpu.core_type = #tpu.core_type<tc>, window_params = [{pipeline_mode = #tpu.pipeline_mode<synchronous>, transform_indices = @transform_0, window_bounds = array<i64: 16, 16>}, {pipeline_mode = #tpu.pipeline_mode<synchronous>, transform_indices = @transform_1, window_bounds = array<i64: 16, 16>}, {transform_indices = @transform_2, window_bounds = array<i64: 6, 16, 16>}, {transform_indices = @transform_3, window_bounds = array<i64: 6, 16, 16>}, {transform_indices = @transform_4, window_bounds = array<i64: 1, 1>}]} {
    %c0 = arith.constant 0 : index
    %c0_0 = arith.constant 0 : index
    %c0_1 = arith.constant 0 : index
    %0 = vector.load %arg3[%c0, %c0_0, %c0_1] : memref<6x16x16xf32, #tpu.memory_space<vmem>>, vector<6x16x16xf32>
    %c0_2 = arith.constant 0 : index
    %c0_3 = arith.constant 0 : index
    %c0_4 = arith.constant 0 : index
    %1 = vector.load %arg4[%c0_2, %c0_3, %c0_4] : memref<6x16x16xf32, #tpu.memory_space<vmem>>, vector<6x16x16xf32>
    %2 = arith.subf %0, %1 : vector<6x16x16xf32>
    %c0_5 = arith.constant 0 : index
    %c0_6 = arith.constant 0 : index
    %3 = vector.load %arg1[%c0_5, %c0_6] : memref<16x16xf32, #tpu.memory_space<vmem>>, vector<16x16xf32>
    %4 = vector.shape_cast %3 : vector<16x16xf32> to vector<1x16x16xf32>
    %5 = vector.broadcast %4 : vector<1x16x16xf32> to vector<6x16x16xf32>
    %c0_7 = arith.constant 0 : index
    %c0_8 = arith.constant 0 : index
    %6 = vector.load %arg2[%c0_7, %c0_8] : memref<16x16xf32, #tpu.memory_space<vmem>>, vector<16x16xf32>
    %7 = vector.shape_cast %6 : vector<16x16xf32> to vector<1x16x16xf32>
    %8 = vector.broadcast %7 : vector<1x16x16xf32> to vector<6x16x16xf32>
    "tpu.trace_start"() <{level = 10 : i32, message = "bhk,bkw->bhw"}> : () -> ()
    %cst = arith.constant dense<0.000000e+00> : vector<6x16x16xf32>
    %9 = tpu.matmul %5, %2, %cst {dimension_numbers = #tpu.dot_dimension_numbers<[2], [1], [1], [2], [0, 0, 0, 1, 1, 2], [0], [0]>} : vector<6x16x16xf32>, vector<6x16x16xf32>, vector<6x16x16xf32> -> vector<6x16x16xf32>
    "tpu.trace_stop"() : () -> ()
    "tpu.trace_start"() <{level = 10 : i32, message = "bhw,bwv->bhv"}> : () -> ()
    %cst_9 = arith.constant dense<0.000000e+00> : vector<6x16x16xf32>
    %10 = tpu.matmul %9, %8, %cst_9 {dimension_numbers = #tpu.dot_dimension_numbers<[2], [1], [1], [2], [0, 0, 0, 1, 1, 2], [0], [0]>} : vector<6x16x16xf32>, vector<6x16x16xf32>, vector<6x16x16xf32> -> vector<6x16x16xf32>
    "tpu.trace_stop"() : () -> ()
    %11 = arith.subf %2, %10 : vector<6x16x16xf32>
    %12 = math.absf %11 : vector<6x16x16xf32>
    %13 = vector.shape_cast %12 : vector<6x16x16xf32> to vector<1x6x16x16xf32>
    %cst_10 = arith.constant dense<0.000000e+00> : vector<1xf32>
    %14 = vector.multi_reduction <add>, %13, %cst_10 [1, 2, 3] : vector<1x6x16x16xf32> to vector<1xf32>
    %15 = vector.shape_cast %14 : vector<1xf32> to vector<1x1x1x1xf32>
    %16 = vector.extract %15[0, 0, 0, 0] : f32 from vector<1x1x1x1xf32>
    %c0_11 = arith.constant 0 : index
    %c0_12 = arith.constant 0 : index
    %17 = memref.load %arg5[%c0_11, %c0_12] : memref<1x1xf32, #tpu.memory_space<smem>>
    memref.store %16, %arg5[%c0_11, %c0_12] : memref<1x1xf32, #tpu.memory_space<smem>>
    return
  }
  func.func @transform_0(%arg0: i32) -> (i32, i32) {
    %c0_i32 = arith.constant 0 : i32
    %c0_i32_0 = arith.constant 0 : i32
    %c0_i32_1 = arith.constant 0 : i32
    return %c0_i32, %c0_i32_0 : i32, i32
  }
  func.func @transform_1(%arg0: i32) -> (i32, i32) {
    %c0_i32 = arith.constant 0 : i32
    %c0_i32_0 = arith.constant 0 : i32
    %c0_i32_1 = arith.constant 0 : i32
    return %c0_i32, %c0_i32_0 : i32, i32
  }
  func.func @transform_2(%arg0: i32) -> (i32, i32, i32) {
    %c0_i32 = arith.constant 0 : i32
    %c0_i32_0 = arith.constant 0 : i32
    %c0_i32_1 = arith.constant 0 : i32
    return %arg0, %c0_i32, %c0_i32_0 : i32, i32, i32
  }
  func.func @transform_3(%arg0: i32) -> (i32, i32, i32) {
    %c0_i32 = arith.constant 0 : i32
    %c0_i32_0 = arith.constant 0 : i32
    %c0_i32_1 = arith.constant 0 : i32
    return %arg0, %c0_i32, %c0_i32_0 : i32, i32, i32
  }
  func.func @transform_4(%arg0: i32) -> (i32, i32) {
    %c0_i32 = arith.constant 0 : i32
    %c0_i32_0 = arith.constant 0 : i32
    return %arg0, %c0_i32 : i32, i32
  }
}

</mosaic_0001>

<bundles_post_ra>
// kernel: tpu_custom_call.1
= control target key start
LH: loop header
LB: loop body
LE: loop exit
PB: predicated region body
PF: predicated region fallthrough
CT: control target
= control target key end

     0   :  { %9 = vsyncpa [#allocation3], 0  ;;  %s804_s0 = inlined_call_operand.hbm [shape: f32[16,16], index: 0, kind: input, shape index: {}]   ;;  %s805_s1 = inlined_call_operand.hbm [shape: f32[16,16], index: 1, kind: input, shape index: {}]   ;;  %s806_s2 = inlined_call_operand.hbm [shape: f32[6,16,16], index: 2, kind: input, shape index: {}]   ;;  %s807_s3 = inlined_call_operand.hbm [shape: f32[6,16,16], index: 3, kind: input, shape index: {}]   ;;  %s808_s4 = inlined_call_operand.hbm [shape: f32[1,1], index: 4, kind: output, shape index: {}]  }
   0x1   :  { %10 = vsyncpa [#allocation6], 0 }
   0x2   :  { %11 = vsyncpa [#allocation9], 0 }
   0x3   :  { %12 = vsyncpa [#allocation4], 0  ;;  %s30_s17 = sshll.u32 %s805_s1, 4  ;;  %s665_s18 = smov [#allocation5]   ;;  %s31_s17 = int_to_ptr.hbm [resolvable:$true] %s30_s17 }
   0x4   :  { %s32_s19 = sshll.u32 %s665_s18, 4  ;;  %s17_s22 = sshll.u32 %s804_s0, 4  ;;  %s33_s19 = int_to_ptr.vmem [resolvable:$true] %s32_s19  ;;  %s18_s22 = int_to_ptr.hbm [resolvable:$true] %s17_s22 }
   0x5   :  { %s666_s23 = smov 128   ;;  %s667_s24 = smov 8  }
   0x6   :  { %38 = dma.hbm_to_vmem [thread:$0]  %s31_s17, 256, %s33_s19, [#allocation6], %s666_s23, %s666_s23, %s667_s24  }
   0x7   :  { %s668_s25 = smov [#allocation2]   ;;  %s43_s29 = sshll.u32 %s806_s2, 4  ;;  %s44_s29 = int_to_ptr.hbm [resolvable:$true] %s43_s29 }
   0x8   :  { %s19_s26 = sshll.u32 %s668_s25, 4  ;;  %s56_s5 = sshll.u32 %s807_s3, 4  ;;  %s20_s26 = int_to_ptr.vmem [resolvable:$true] %s19_s26  ;;  %s57_s5 = int_to_ptr.hbm [resolvable:$true] %s56_s5 }
   0x9   :  { %25 = dma.hbm_to_vmem [thread:$0]  %s18_s22, 256, %s20_s26, [#allocation3], %s666_s23, %s666_s23, %s667_s24  }
   0xa   :  { %s669_s6 = smov [#allocation7]   ;;  %s670_s0 = smov [#allocation8]  }
   0xb   :  { %s45_s7 = sshll.u32 %s669_s6, 4  ;;  %s58_s8 = sshll.u32 %s670_s0, 4  ;;  %s46_s7 = int_to_ptr.vmem [resolvable:$true] %s45_s7  ;;  %s59_s8 = int_to_ptr.vmem [resolvable:$true] %s58_s8 }
   0xc   :  { %51 = dma.hbm_to_vmem [thread:$0]  %s44_s29, 1536, %s46_s7, [#allocation6], %s666_s23, %s666_s23, %s667_s24  }
   0xd   :  { %64 = dma.hbm_to_vmem [thread:$0]  %s57_s5, 1536, %s59_s8, [#allocation9], %s666_s23, %s666_s23, %s667_s24  }
   0xe   :  { %657 = dma.done.wait [#allocation3], 256  }
   0xf   :  { %658 = vsyncadd [#allocation3], 4294967040 }
  0x10   :  { %659 = dma.done.wait [#allocation6], 1792  }
  0x11   :  { %660 = vsyncadd [#allocation6], 4294965504 }
  0x12   :  { %661 = dma.done.wait [#allocation9], 1536  }
  0x13   :  { %662 = vsyncadd [#allocation9], 4294965760  ;;  %v82_v0 = vld [vmem:[#allocation7 + $0x8] sm:$0xff]  ;;  %v81_v2 = vld [vmem:[#allocation7] sm:$0xff]  ;;  %vm121_vm0 = vcmask 130048   ;;  %s503_s9 = sshll.u32 %s808_s4, 4  ;;  %s504_s9 = int_to_ptr.hbm [resolvable:$true] %s503_s9 }
  0x14   :  { %v94_v1 = vld [vmem:[#allocation8 + $0x8] sm:$0xff]  ;;  %v93_v4 = vld [vmem:[#allocation8] sm:$0xff]  ;;  %v84_v9 = vld [vmem:[#allocation7 + $0x18] sm:$0xff]  ;;  %s671_s11 = smov [#allocation10]  }
  0x15   :  { %v709_v3 = vsub.f32 %v82_v0, %v94_v1  ;;  %v711_v5 = vld [vmem:[#allocation2] sm:$0xff]  ;;  %v90_v6 = vld [vmem:[#allocation7 + $0x48] sm:$0xff]  ;;  %v713_v7 = vsub.f32 %v81_v2, %v93_v4  ;;  %v96_v10 = vld [vmem:[#allocation8 + $0x18] sm:$0xff] }
  0x16   :  { %v102_v8 = vld [vmem:[#allocation8 + $0x48] sm:$0xff]  ;;  %v718_v12 = vsub.f32 %v84_v9, %v96_v10  ;;  %v83_v13 = vld [vmem:[#allocation7 + $0x10] sm:$0xff]  ;;  %v92_v15 = vld [vmem:[#allocation7 + $0x58] sm:$0xff] }
  0x17   :  { %142 = vmatpush.msra.mxu0 %v709_v3  ;;  %v716_v11 = vsub.f32 %v90_v6, %v102_v8  ;;  %v95_v14 = vld [vmem:[#allocation8 + $0x10] sm:$0xff]  ;;  %v104_v17 = vld [vmem:[#allocation8 + $0x58] sm:$0xff]  ;;  %v86_v18 = vld [vmem:[#allocation7 + $0x28] sm:$0xff] }
  0x18   :  { %v720_v16 = vsub.f32 %v83_v13, %v95_v14  ;;  %v98_v19 = vld [vmem:[#allocation8 + $0x28] sm:$0xff]  ;;  %165 = vmatpush.msra.mxu1 %v718_v12  ;;  %v724_v20 = vsub.f32 %v92_v15, %v104_v17  ;;  %v85_v22 = vld [vmem:[#allocation7 + $0x20] sm:$0xff]  ;;  %v88_v27 = vld [vmem:[#allocation7 + $0x38] sm:$0xff] }
  0x19   :  { %143 = vmatpush.msra.mxu0 %v713_v7  ;;  %v726_v21 = vsub.f32 %v86_v18, %v98_v19  ;;  %v97_v23 = vld [vmem:[#allocation8 + $0x20] sm:$0xff]  ;;  %v100_v29 = vld [vmem:[#allocation8 + $0x38] sm:$0xff]  ;;  %v87_v30 = vld [vmem:[#allocation7 + $0x30] sm:$0xff] }
  0x1a   :  { %516 = vmatmul.msk.f32.vlgmr.msra.gmra.mxu0 %vm121_vm0, %v711_v5  ;;  %v730_v24 = vsub.f32 %v85_v22, %v97_v23  ;;  %v89_v25 = vld [vmem:[#allocation7 + $0x40] sm:$0xff]  ;;  %166 = vmatpush.msra.mxu1 %v720_v16  ;;  %v99_v31 = vld [vmem:[#allocation8 + $0x30] sm:$0xff]  ;;  %v739_v32 = vsub.f32 %v88_v27, %v100_v29  ;;  %v120_v37 = vld [vmem:[#allocation5 + $0x8] sm:$0xff] }
  0x1b   :  { %v101_v26 = vld [vmem:[#allocation8 + $0x40] sm:$0xff]  ;;  %234 = vmatpush.msrb.mxu0 %v716_v11  ;;  %518 = vmatmul.msk.f32.vlgmr.msra.gmra.mxu1 %vm121_vm0, %v711_v5  ;;  %v741_v33 = vsub.f32 %v87_v30, %v99_v31  ;;  %v91_v34 = vld [vmem:[#allocation7 + $0x50] sm:$0xff]  ;;  %v118_v38 = vld [vmem:[#allocation2 + $0x8] sm:$0xff] }
  0x1c   :  { %v734_v28 = vsub.f32 %v89_v25, %v101_v26  ;;  %188 = vmatpush.msra.mxu2 %v726_v21  ;;  %v103_v35 = vld [vmem:[#allocation8 + $0x50] sm:$0xff]  ;;  %257 = vmatpush.msrb.mxu1 %v724_v20 }
  0x1d   :  { %v745_v36 = vsub.f32 %v91_v34, %v103_v35  ;;  %211 = vmatpush.msra.mxu3 %v739_v32  ;;  %v119_v39 = vld [vmem:[#allocation5] sm:$0xff] }
  0x1e   :  { %235 = vmatpush.msrb.mxu0 %v734_v28  ;;  %189 = vmatpush.msra.mxu2 %v730_v24 }
  0x1f   :  { %520 = vmatmul.msk.f32.vlgmr.msra.gmra.mxu2 %vm121_vm0, %v711_v5  ;;  %258 = vmatpush.msrb.mxu1 %v745_v36 }
  0x20   :  { %212 = vmatpush.msra.mxu3 %v741_v33  ;;  %286 = vmatpush.msrb.mxu2 %v120_v37 }
  0x21   :  { %522 = vmatmul.msk.f32.vlgmr.msra.gmra.mxu3 %vm121_vm0, %v711_v5  ;;  %344 = vmatpush.msra.mxu0 %v120_v37 }
  0x22   :  { %517 = vmatmul.msk.f32.gmra.mxu0 %vm121_vm0, %v118_v38  ;;  %315 = vmatpush.msrb.mxu3 %v120_v37 }
  0x23   :  { %287 = vmatpush.msrb.mxu2 %v119_v39  ;;  %373 = vmatpush.msra.mxu1 %v120_v37 }
  0x24   :  { %519 = vmatmul.msk.f32.gmra.mxu1 %vm121_vm0, %v118_v38  ;;  %316 = vmatpush.msrb.mxu3 %v119_v39 }
  0x25   :  { %402 = vmatpush.msra.mxu2 %v120_v37  ;;  %345 = vmatpush.msra.mxu0 %v119_v39 }
  0x26   :  { %431 = vmatpush.msra.mxu3 %v120_v37  ;;  %374 = vmatpush.msra.mxu1 %v119_v39 }
  0x27   :  { %521 = vmatmul.msk.f32.gmra.mxu2 %vm121_vm0, %v118_v38 }
  0x28   :  { %432 = vmatpush.msra.mxu3 %v119_v39  ;;  %403 = vmatpush.msra.mxu2 %v119_v39 }
  0x29   :  { %523 = vmatmul.msk.f32.gmra.mxu3 %vm121_vm0, %v118_v38 }
  0x2a   :  { %524 = vmatmul.msk.f32.vlgmr.msrb.gmra.mxu0 %vm121_vm0, %v711_v5 }
  0x2c   :  { %526 = vmatmul.msk.f32.vlgmr.msrb.gmra.mxu1 %vm121_vm0, %v711_v5 }
  0x32   :  { %525 = vmatmul.msk.f32.gmra.mxu0 %vm121_vm0, %v118_v38 }
  0x34   :  { %527 = vmatmul.msk.f32.gmra.mxu1 %vm121_vm0, %v118_v38 }
  0x97   :  { %v145_v40 = vpop.f32.mrf.mxu0 }
  0x98   :  { %528 = vmatmul.msk.f32.vlgmr.msrb.gmra.mxu2 %vm121_vm0, %v145_v40  ;;  %v168_v41 = vpop.f32.mrf.mxu1 }
  0x99   :  { %530 = vmatmul.msk.f32.vlgmr.msrb.gmra.mxu3 %vm121_vm0, %v168_v41 }
  0x9f   :  { %v148_v42 = vpop.f32.mrf.mxu0 }
  0xa0   :  { %529 = vmatmul.msk.f32.gmra.mxu2 %vm121_vm0, %v148_v42 }
  0xa1   :  { %v171_v43 = vpop.f32.mrf.mxu1 }
  0xa2   :  { %531 = vmatmul.msk.f32.gmra.mxu3 %vm121_vm0, %v171_v43  ;;  %v191_v44 = vpop.f32.mrf.mxu2 }
  0xa3   :  { %532 = vmatmul.msk.f32.vlgmr.msra.gmra.mxu0 %vm121_vm0, %v191_v44 }
  0xa4   :  { %v214_v45 = vpop.f32.mrf.mxu3 }
  0xa5   :  { %534 = vmatmul.msk.f32.vlgmr.msra.gmra.mxu1 %vm121_vm0, %v214_v45 }
  0xa7   :  { %v237_v46 = vpop.f32.mrf.mxu0 }
  0xa8   :  { %536 = vmatmul.msk.f32.vlgmr.msra.gmra.mxu2 %vm121_vm0, %v237_v46 }
  0xa9   :  { %v260_v47 = vpop.f32.mrf.mxu1 }
  0xaa   :  { %538 = vmatmul.msk.f32.vlgmr.msra.gmra.mxu3 %vm121_vm0, %v260_v47  ;;  %v194_v48 = vpop.f32.mrf.mxu2 }
  0xab   :  { %533 = vmatmul.msk.f32.gmra.mxu0 %vm121_vm0, %v194_v48 }
  0xac   :  { %v217_v49 = vpop.f32.mrf.mxu3 }
  0xad   :  { %535 = vmatmul.msk.f32.gmra.mxu1 %vm121_vm0, %v217_v49 }
  0xaf   :  { %v240_v50 = vpop.f32.mrf.mxu0 }
  0xb0   :  { %537 = vmatmul.msk.f32.gmra.mxu2 %vm121_vm0, %v240_v50 }
  0xb1   :  { %v263_v51 = vpop.f32.mrf.mxu1 }
  0xb2   :  { %539 = vmatmul.msk.f32.gmra.mxu3 %vm121_vm0, %v263_v51 }
 0x11b   :  { %v289_v52 = vpop.f32.mrf.mxu2 }
 0x11c   :  { %v318_v53 = vpop.f32.mrf.mxu3  ;;  %v440_v54 = vsub.f32 %v713_v7, %v289_v52 }
 0x11d   :  { %v442_v56 = vsub.f32 %v720_v16, %v318_v53 }
 0x11e   :  { %v452_v59 = vand.u32 2147483647, %v440_v54 }
 0x11f   :  { %v454_v63 = vand.u32 2147483647, %v442_v56 }
 0x120   :  { %v347_v55 = vpop.f32.mrf.mxu0  ;;  %v464_v2 = vsel %vm121_vm0, %v452_v59, 0.0 }
 0x121   :  { %v444_v61 = vsub.f32 %v730_v24, %v347_v55  ;;  %v467_v10 = vsel %vm121_vm0, %v454_v63, 0.0 }
 0x122   :  { %v376_v57 = vpop.f32.mrf.mxu1 }
 0x123   :  { %v292_v58 = vpop.f32.mrf.mxu2  ;;  %v456_v8 = vand.u32 2147483647, %v444_v61  ;;  %v446_v13 = vsub.f32 %v741_v33, %v376_v57 }
 0x124   :  { %v441_v60 = vsub.f32 %v709_v3, %v292_v58 }
 0x125   :  { %v321_v62 = vpop.f32.mrf.mxu3  ;;  %v471_v18 = vsel %vm121_vm0, %v456_v8, 0.0  ;;  %v458_v23 = vand.u32 2147483647, %v446_v13 }
 0x126   :  { %v453_v0 = vand.u32 2147483647, %v441_v60  ;;  %v443_v1 = vsub.f32 %v718_v12, %v321_v62 }
 0x127   :  { %v475_v29 = vsel %vm121_vm0, %v458_v23, 0.0 }
 0x128   :  { %v465_v4 = vsel %vm121_vm0, %v453_v0, 0.0  ;;  %v455_v5 = vand.u32 2147483647, %v443_v1  ;;  %v350_v6 = vpop.f32.mrf.mxu0 }
 0x129   :  { %v466_v7 = vadd.f32 %v465_v4, %v464_v2  ;;  %v445_v9 = vsub.f32 %v726_v21, %v350_v6 }
 0x12a   :  { %v469_v3 = vsel %vm121_vm0, %v455_v5, 0.0  ;;  %v379_v14 = vpop.f32.mrf.mxu1 }
 0x12b   :  { %v468_v15 = vadd.f32 %v467_v10, %v466_v7  ;;  %v457_v16 = vand.u32 2147483647, %v445_v9  ;;  %v405_v12 = vpop.f32.mrf.mxu2  ;;  %v447_v17 = vsub.f32 %v739_v32, %v379_v14 }
 0x12c   :  { %v448_v21 = vsub.f32 %v734_v28, %v405_v12 }
 0x12d   :  { %v470_v19 = vadd.f32 %v469_v3, %v468_v15  ;;  %v434_v22 = vpop.f32.mrf.mxu3  ;;  %v473_v24 = vsel %vm121_vm0, %v457_v16, 0.0  ;;  %v459_v25 = vand.u32 2147483647, %v447_v17 }
 0x12e   :  { %v460_v30 = vand.u32 2147483647, %v448_v21  ;;  %v450_v33 = vsub.f32 %v745_v36, %v434_v22 }
 0x12f   :  { %v472_v26 = vadd.f32 %v471_v18, %v470_v19  ;;  %v477_v31 = vsel %vm121_vm0, %v459_v25, 0.0 }
 0x130   :  { %v479_v39 = vsel %vm121_vm0, %v460_v30, 0.0  ;;  %v462_v40 = vand.u32 2147483647, %v450_v33 }
 0x131   :  { %v474_v27 = vadd.f32 %v473_v24, %v472_v26 }
 0x132   :  { %v483_v46 = vsel %vm121_vm0, %v462_v40, 0.0 }
 0x133   :  { %v476_v32 = vadd.f32 %v475_v29, %v474_v27  ;;  %v408_v34 = vpop.f32.mrf.mxu2 }
 0x134   :  { %v449_v35 = vsub.f32 %v716_v11, %v408_v34 }
 0x135   :  { %v478_v37 = vadd.f32 %v477_v31, %v476_v32  ;;  %v437_v38 = vpop.f32.mrf.mxu3 }
 0x136   :  { %v461_v28 = vand.u32 2147483647, %v449_v35  ;;  %v451_v41 = vsub.f32 %v724_v20, %v437_v38 }
 0x137   :  { %v480_v42 = vadd.f32 %v479_v39, %v478_v37 }
 0x138   :  { %v481_v43 = vsel %vm121_vm0, %v461_v28, 0.0  ;;  %v463_v44 = vand.u32 2147483647, %v451_v41 }
 0x139   :  { %v482_v45 = vadd.f32 %v481_v43, %v480_v42 }
 0x13a   :  { %v485_v36 = vsel %vm121_vm0, %v463_v44, 0.0 }
 0x13b   :  { %v484_v47 = vadd.f32 %v483_v46, %v482_v45 }
 0x13d   :  { %v486_v48 = vadd.f32 %v485_v36, %v484_v47 }
 0x13f   :  { %487 = vadd.xlane.f32.xlu0 %v486_v48 }
 0x1b2   :  { %v488_v11 = vpop.xlane.xlu0 %487 }
 0x1b3   :  { %v489_v49 = vrot.slane %v488_v11, 4 }
 0x1b5   :  { %v490_v50 = vadd.f32 %v489_v49, %v488_v11 }
 0x1b7   :  { %v491_v51 = vrot.slane %v490_v50, 2 }
 0x1b9   :  { %v492_v52 = vadd.f32 %v491_v51, %v490_v50 }
 0x1bb   :  { %v493_v53 = vrot.slane %v492_v52, 1 }
 0x1bd   :  { %v494_v54 = vadd.f32 %v493_v53, %v492_v52 }
 0x1bf   :  { %540 = vpush %v494_v54 }
 0x1f0   :  { %s541_s10 = spop %540 }
 0x1f1   :  { %497 = sst [smem:[#allocation10]] %s541_s10 }
 0x1f2   :  { %506 = dma.smem_to_hbm %s671_s11, 16, %s504_s9, [#allocation4]  }
 0x1f3   :  { %663 = dma.done.wait [#allocation4], 16  }
 0x1f4   :  { %664 = vsyncadd [#allocation4], 4294967280 }
 0x1f5   :  { %511 = sfence }
 0x1f6   :  { %512 = vsyncpa [#allocation3], 1 }
 0x1f7   :  { %513 = vsyncpa [#allocation6], 1 }
 0x1f8   :  { %514 = vsyncpa [#allocation9], 1 }
 0x1f9   :  { %515 = vsyncpa [#allocation4], 1 }

</bundles_post_ra>
